<compile_context>
chip_gen: v7x
topology: tpu7x:2x2x1
jax: 0.10.0
libtpu: 0.0.40
codegen_flags: <defaults>
</compile_context>

<pallas_src>
import numpy as np
import jax
import jax.numpy as jnp
from jax.experimental import pallas as pl
from jax.experimental.pallas import tpu as pltpu

LEAKY_SLOPE = 0.01                  # torch.nn.LeakyReLU default
HIDDEN_DIMS = [64, 64, 32, 32]      # encoder widths
HIDDEN_DIMS_REV = [32, 32, 64, 64]  # decoder widths (reversed)
LATENT_DIM = 32                     # encoder output width (hidden_dims[-1])
FEAT = 128                          # lane-dense working width per batch half
N_LAYERS = 9                        # 4 encoder + 4 fused decoder + 1 fused final
Z_LAYER = 3                         # layer index whose activation is z


def _round_up(n, m):
    return ((n + m - 1) // m) * m


def default_fold():
    """fold=2 packs two batch halves side-by-side (256-wide block-diag weights)
    to fill the 256x256 MXUs on v6e / v7x; fold=1 for v5e and older (128x128
    MXU already fully used by 128-wide matmuls)."""
    try:
        kind = jax.devices()[0].device_kind.lower()
    except Exception:
        return 1
    if "tpu" not in kind:
        return 1
    for old in ("v2", "v3", "v4", "v5"):
        if old in kind:
            return 1
    return 2


# --------------------------------------------------------------------------
# Kernel
# --------------------------------------------------------------------------
def _adv_fc_kernel(x_ref, w0_ref, w_ref, b_ref, out_ref):
    # x_ref  : (TBf, Din)       f32   Din = fold*in_dim (no 128-lane padding)
    # w0_ref : (Din, Wd)        f32/bf16  layer-0 weights (block-diag per fold)
    # w_ref  : (8, Wd, Wd)      f32/bf16  fused weights for layers 1..8
    # b_ref  : (9, 1, Wd)       f32   biases
    # out_ref: (TBf, Wd)        f32   per 128-lane half: [z | signal | noise | 0]
    cd = w0_ref.dtype
    x = x_ref[...]
    a = x if x.dtype == cd else x.astype(cd)
    y = jnp.dot(a, w0_ref[...], preferred_element_type=jnp.float32) + b_ref[0]
    h = jnp.where(y > 0, y, LEAKY_SLOPE * y)          # LeakyReLU in f32 (VPU)

    z_slab = None
    for k in range(1, N_LAYERS):                      # unrolled at trace time
        a = h if h.dtype == cd else h.astype(cd)      # bf16 feed to MXU
        y = jnp.dot(a, w_ref[k - 1], preferred_element_type=jnp.float32) + b_ref[k]
        if k < N_LAYERS - 1:
            h = jnp.where(y > 0, y, LEAKY_SLOPE * y)
        else:
            h = y                                     # final linear: no act
        if k == Z_LAYER:
            # z lives in cols [0:32) of each half; all other cols are exactly 0.
            z_slab = h

    # The fused final layer writes signal/noise into cols [32, 32+2*in_dim) and
    # leaves cols [0:32) exactly zero, so a single add merges z and keeps ONE
    # unmasked lane-dense 128-wide store per half.  z_slab is a VMEM-resident
    # value (<= 0.5 MiB), not vregs, so holding it costs ~nothing.
    out_ref[...] = h + z_slab


# --------------------------------------------------------------------------
# Wrapper
# --------------------------------------------------------------------------
def adversarial_fc_forward(x, w0, w_rest, b_slab, *, in_dim, block_b=1024):
    """Runs the fused forward. Returns (signal, noise, z)."""
    n = x.shape[0]
    assert x.shape[1] == in_dim
    wd = w_rest.shape[-1]
    fold = wd // FEAT
    assert fold in (1, 2)
    assert w0.shape == (fold * in_dim, wd)
    assert LATENT_DIM + 2 * in_dim <= FEAT, "packed 128-lane output needs in_dim <= 48"

    rm = 8 * fold                                     # row multiple per tile
    tb = min(_round_up(block_b, rm), _round_up(n, rm))
    # Ensure >= 2 grid tiles when possible so v7x's two TensorCores both get work.
    if _round_up(n, tb) == tb and tb > rm:
        tb = max(rm, _round_up((tb + 1) // 2, rm))
    n_pad = _round_up(n, tb)

    x32 = x.astype(jnp.float32)
    if n_pad != n:                                    # pad batch rows only
        x32 = jnp.pad(x32, ((0, n_pad - n), (0, 0)))
    # fold=2: interleave adjacent rows into lane halves (contiguous, free).
    xk = x32.reshape(n_pad // fold, fold * in_dim)
    tbf = tb // fold

    out = pl.pallas_call(
        _adv_fc_kernel,
        out_shape=jax.ShapeDtypeStruct((n_pad // fold, wd), jnp.float32),
        grid_spec=pltpu.PrefetchScalarGridSpec(
            num_scalar_prefetch=0,
            grid=(n_pad // tb,),
            in_specs=[
                pl.BlockSpec((tbf, fold * in_dim), lambda i: (i, 0)),
                # constant index maps -> params loaded once, VMEM-resident
                pl.BlockSpec((fold * in_dim, wd), lambda i: (0, 0)),
                pl.BlockSpec((N_LAYERS - 1, wd, wd), lambda i: (0, 0, 0)),
                pl.BlockSpec((N_LAYERS, 1, wd), lambda i: (0, 0, 0)),
            ],
            out_specs=pl.BlockSpec((tbf, wd), lambda i: (i, 0)),
        ),
        compiler_params=pltpu.CompilerParams(
            dimension_semantics=("parallel",)),       # 2-TC split on v7x
    )(xk, w0, w_rest, b_slab)

    out_flat = out.reshape(n_pad, FEAT)[:n]           # contiguous, free
    z = out_flat[:, 0:LATENT_DIM]
    signal = out_flat[:, LATENT_DIM:LATENT_DIM + in_dim]
    noise = out_flat[:, LATENT_DIM + in_dim:LATENT_DIM + 2 * in_dim]
    return signal, noise, z


# --------------------------------------------------------------------------
# Parameter init (nn.Linear-like) and host-side packing
# --------------------------------------------------------------------------
def init_params(key, in_dim):
    """List of 14 (W(in,out), b(1,out)) tuples in PyTorch forward order."""
    def linear_params(k, fan_in, fan_out):
        kw, kb = jax.random.split(k)
        bound = 1.0 / float(np.sqrt(fan_in))
        w = jax.random.uniform(kw, (fan_in, fan_out), jnp.float32, -bound, bound)
        b = jax.random.uniform(kb, (1, fan_out), jnp.float32, -bound, bound)
        return w, b

    params = []
    keys = jax.random.split(key, 14)
    ki = 0
    d = in_dim
    for h in HIDDEN_DIMS:                                   # encoder
        params.append(linear_params(keys[ki], d, h)); ki += 1
        d = h
    d = HIDDEN_DIMS_REV[0]
    for h in HIDDEN_DIMS_REV:                               # decoder_signal
        params.append(linear_params(keys[ki], d, h)); ki += 1
        d = h
    params.append(linear_params(keys[ki], HIDDEN_DIMS_REV[-1], in_dim)); ki += 1
    d = HIDDEN_DIMS_REV[0]
    for h in HIDDEN_DIMS_REV:                               # decoder_noise
        params.append(linear_params(keys[ki], d, h)); ki += 1
        d = h
    params.append(linear_params(keys[ki], HIDDEN_DIMS_REV[-1], in_dim)); ki += 1
    return params


def pack_params(params, in_dim, weight_dtype=jnp.bfloat16, fold=1):
    """Pack 14 Linear layers into (w0, w_rest, bias) slabs.

    fold=1: w0 (in_dim,128), w_rest (8,128,128), bias (9,1,128).
    fold=2: block-diagonal duplicates for two batch halves ->
            w0 (2*in_dim,256), w_rest (8,256,256), bias (9,1,256).
    bf16 weights are the default: MXUs are bf16-native on every generation;
    accumulation stays f32 inside the kernel.
    """
    assert fold in (1, 2)
    assert LATENT_DIM + 2 * in_dim <= FEAT, "packed output layout needs in_dim <= 48"
    enc, dec_s, fin_s = params[0:4], params[4:8], params[8]
    dec_n, fin_n = params[9:13], params[13]

    W0 = np.zeros((in_dim, FEAT), np.float32)
    W = np.zeros((N_LAYERS - 1, FEAT, FEAT), np.float32)
    B = np.zeros((N_LAYERS, 1, FEAT), np.float32)

    def put(k, w, b, r0, c0):
        w = np.asarray(w, np.float32)
        b = np.asarray(b, np.float32).reshape(-1)
        if k == 0:
            W0[r0:r0 + w.shape[0], c0:c0 + w.shape[1]] = w
        else:
            W[k - 1, r0:r0 + w.shape[0], c0:c0 + w.shape[1]] = w
        B[k, 0, c0:c0 + b.shape[0]] = b

    # encoder layers 0..3 (top-left blocks)
    for k, (w, b) in enumerate(enc):
        put(k, w, b, 0, 0)

    widths = HIDDEN_DIMS_REV  # [32, 32, 64, 64]
    # fused decoder layer 1: both branches read z (cols 0:32); concat outputs
    (ws, bs), (wn, bn) = dec_s[0], dec_n[0]
    put(4, ws, bs, 0, 0)
    put(4, wn, bn, 0, widths[0])
    # fused decoder layers 2..4: block-diagonal
    for j in range(1, 4):
        (ws, bs), (wn, bn) = dec_s[j], dec_n[j]
        put(4 + j, ws, bs, 0, 0)
        put(4 + j, wn, bn, widths[j - 1], widths[j])
    # fused final layer, SHIFTED by LATENT_DIM so cols [0:32) stay free for z:
    #   signal -> cols [32, 32+in_dim), noise -> cols [32+in_dim, 32+2*in_dim)
    (ws, bs), (wn, bn) = fin_s, fin_n
    put(8, ws, bs, 0, LATENT_DIM)
    put(8, wn, bn, widths[-1], LATENT_DIM + in_dim)

    if fold == 2:
        W0f = np.zeros((2 * in_dim, 2 * FEAT), np.float32)
        W0f[:in_dim, :FEAT] = W0
        W0f[in_dim:, FEAT:] = W0
        Wf = np.zeros((N_LAYERS - 1, 2 * FEAT, 2 * FEAT), np.float32)
        Wf[:, :FEAT, :FEAT] = W
        Wf[:, FEAT:, FEAT:] = W
        Bf = np.concatenate([B, B], axis=-1)
        W0, W, B = W0f, Wf, Bf

    return (jnp.asarray(W0, weight_dtype), jnp.asarray(W, weight_dtype),
            jnp.asarray(B, jnp.float32))


# --------------------------------------------------------------------------
# Pure-JAX reference (mirrors the PyTorch forward; GRL is identity forward)
# --------------------------------------------------------------------------
def reference_forward(x, params, compute_dtype=jnp.float32):
    def lin(h, w, b):
        return jnp.dot(h.astype(compute_dtype), w.astype(compute_dtype),
                       preferred_element_type=jnp.float32) + b

    h = x.astype(jnp.float32)
    idx = 0
    for _ in range(4):
        w, b = params[idx]; idx += 1
        h = jax.nn.leaky_relu(lin(h, w, b), LEAKY_SLOPE)
    z = h
    s = z
    for _ in range(4):
        w, b = params[idx]; idx += 1
        s = jax.nn.leaky_relu(lin(s, w, b), LEAKY_SLOPE)
    w, b = params[idx]; idx += 1
    signal = lin(s, w, b)
    nz = z
    for _ in range(4):
        w, b = params[idx]; idx += 1
        nz = jax.nn.leaky_relu(lin(nz, w, b), LEAKY_SLOPE)
    w, b = params[idx]; idx += 1
    noise = lin(nz, w, b)
    return signal, noise, z


if __name__ == "__main__":
    key = jax.random.PRNGKey(0)
    kx, kp, kx2 = jax.random.split(key, 3)

    batch, in_dim = 8, 16
    x = jax.random.normal(kx, (batch, in_dim), dtype=jnp.float32)
    params = init_params(kp, in_dim)
    ref_s, ref_n, ref_z = reference_forward(x, params, jnp.float32)

    # ---- f32 weights: exact semantics of the PyTorch module, both folds ----
    for fold in (1, 2):
        w0, wr, bs = pack_params(params, in_dim, jnp.float32, fold=fold)
        signal, noise, z = adversarial_fc_forward(x, w0, wr, bs, in_dim=in_dim)
        jax.block_until_ready((signal, noise, z))
        assert signal.shape == (batch, in_dim)
        assert noise.shape == (batch, in_dim)
        assert z.shape == (batch, LATENT_DIM)
        assert jnp.allclose(signal, ref_s, atol=1e-4, rtol=1e-3)
        assert jnp.allclose(noise, ref_n, atol=1e-4, rtol=1e-3)
        assert jnp.allclose(z, ref_z, atol=1e-4, rtol=1e-3)

    # ---- bf16 weights (default; MXU fast path, f32 accumulate), both folds ----
    rbf = reference_forward(x, params, jnp.bfloat16)
    for fold in (1, 2):
        w0, wr, bs = pack_params(params, in_dim, fold=fold)   # bf16 default
        outs = adversarial_fc_forward(x, w0, wr, bs, in_dim=in_dim)
        jax.block_until_ready(outs)
        for got, want in zip(outs, rbf):
            assert jnp.allclose(got, want, atol=1e-2, rtol=1e-2)

    # ---- multi-tile path: non-multiple batch, fold auto-selected per chip ----
    fold = default_fold()
    x2 = jax.random.normal(kx2, (300, in_dim), dtype=jnp.float32)
    w0, wr, bs = pack_params(params, in_dim, jnp.float32, fold=fold)
    s2, n2, z2 = adversarial_fc_forward(x2, w0, wr, bs, in_dim=in_dim, block_b=128)
    jax.block_until_ready((s2, n2, z2))
    r2s, r2n, r2z = reference_forward(x2, params, jnp.float32)
    assert jnp.allclose(s2, r2s, atol=1e-4, rtol=1e-3)
    assert jnp.allclose(n2, r2n, atol=1e-4, rtol=1e-3)
    assert jnp.allclose(z2, r2z, atol=1e-4, rtol=1e-3)

    print("KERNEL_OK")
</pallas_src>

<mosaic_0001>
module attributes {stable_mosaic.version = 11 : i64} {
  func.func @_adv_fc_kernel(%arg0: i32, %arg1: memref<8x16xf32, #tpu.memory_space<vmem>>, %arg2: memref<16x128xf32, #tpu.memory_space<vmem>>, %arg3: memref<8x128x128xf32, #tpu.memory_space<vmem>>, %arg4: memref<9x1x128xf32, #tpu.memory_space<vmem>>, %arg5: memref<8x128xf32, #tpu.memory_space<vmem>>) attributes {dimension_semantics = [#tpu.dimension_semantics<parallel>], iteration_bounds = array<i64: 1>, scalar_prefetch = 0 : i64, scratch_operands = 0 : i64, tpu.core_type = #tpu.core_type<tc>, window_params = [{transform_indices = @transform_0, window_bounds = array<i64: 8, 16>}, {pipeline_mode = #tpu.pipeline_mode<synchronous>, transform_indices = @transform_1, window_bounds = array<i64: 16, 128>}, {pipeline_mode = #tpu.pipeline_mode<synchronous>, transform_indices = @transform_2, window_bounds = array<i64: 8, 128, 128>}, {pipeline_mode = #tpu.pipeline_mode<synchronous>, transform_indices = @transform_3, window_bounds = array<i64: 9, 1, 128>}, {transform_indices = @transform_4, window_bounds = array<i64: 8, 128>}]} {
    %c0 = arith.constant 0 : index
    %c0_0 = arith.constant 0 : index
    %0 = vector.load %arg1[%c0, %c0_0] : memref<8x16xf32, #tpu.memory_space<vmem>>, vector<8x16xf32>
    %c0_1 = arith.constant 0 : index
    %c0_2 = arith.constant 0 : index
    %1 = vector.load %arg2[%c0_1, %c0_2] : memref<16x128xf32, #tpu.memory_space<vmem>>, vector<16x128xf32>
    %cst = arith.constant dense<0.000000e+00> : vector<8x128xf32>
    %2 = tpu.matmul %0, %1, %cst {dimension_numbers = #tpu.dot_dimension_numbers<[1], [0], [0], [1], [0, 0, 1, 1], [], []>} : vector<8x16xf32>, vector<16x128xf32>, vector<8x128xf32> -> vector<8x128xf32>
    %c0_3 = arith.constant 0 : index
    %c0_4 = arith.constant 0 : index
    %c0_5 = arith.constant 0 : index
    %3 = vector.load %arg4[%c0_3, %c0_4, %c0_5] : memref<9x1x128xf32, #tpu.memory_space<vmem>>, vector<1x1x128xf32>
    %4 = vector.shape_cast %3 : vector<1x1x128xf32> to vector<1x128xf32>
    %5 = vector.broadcast %4 : vector<1x128xf32> to vector<8x128xf32>
    %6 = arith.addf %2, %5 : vector<8x128xf32>
    %cst_6 = arith.constant 0.000000e+00 : f32
    %7 = vector.broadcast %cst_6 : f32 to vector<8x128xf32>
    %8 = arith.cmpf ogt, %6, %7 : vector<8x128xf32>
    %cst_7 = arith.constant 0.00999999977 : f32
    %9 = vector.broadcast %cst_7 : f32 to vector<8x128xf32>
    %10 = arith.mulf %9, %6 : vector<8x128xf32>
    %11 = arith.select %8, %6, %10 : vector<8x128xi1>, vector<8x128xf32>
    %c0_8 = arith.constant 0 : index
    %c0_9 = arith.constant 0 : index
    %c0_10 = arith.constant 0 : index
    %12 = vector.load %arg3[%c0_8, %c0_9, %c0_10] : memref<8x128x128xf32, #tpu.memory_space<vmem>>, vector<1x128x128xf32>
    %13 = vector.shape_cast %12 : vector<1x128x128xf32> to vector<128x128xf32>
    %cst_11 = arith.constant dense<0.000000e+00> : vector<8x128xf32>
    %14 = tpu.matmul %11, %13, %cst_11 {dimension_numbers = #tpu.dot_dimension_numbers<[1], [0], [0], [1], [0, 0, 1, 1], [], []>} : vector<8x128xf32>, vector<128x128xf32>, vector<8x128xf32> -> vector<8x128xf32>
    %c1 = arith.constant 1 : index
    %c0_12 = arith.constant 0 : index
    %c0_13 = arith.constant 0 : index
    %15 = vector.load %arg4[%c1, %c0_12, %c0_13] : memref<9x1x128xf32, #tpu.memory_space<vmem>>, vector<1x1x128xf32>
    %16 = vector.shape_cast %15 : vector<1x1x128xf32> to vector<1x128xf32>
    %17 = vector.broadcast %16 : vector<1x128xf32> to vector<8x128xf32>
    %18 = arith.addf %14, %17 : vector<8x128xf32>
    %cst_14 = arith.constant 0.000000e+00 : f32
    %19 = vector.broadcast %cst_14 : f32 to vector<8x128xf32>
    %20 = arith.cmpf ogt, %18, %19 : vector<8x128xf32>
    %cst_15 = arith.constant 0.00999999977 : f32
    %21 = vector.broadcast %cst_15 : f32 to vector<8x128xf32>
    %22 = arith.mulf %21, %18 : vector<8x128xf32>
    %23 = arith.select %20, %18, %22 : vector<8x128xi1>, vector<8x128xf32>
    %c1_16 = arith.constant 1 : index
    %c0_17 = arith.constant 0 : index
    %c0_18 = arith.constant 0 : index
    %24 = vector.load %arg3[%c1_16, %c0_17, %c0_18] : memref<8x128x128xf32, #tpu.memory_space<vmem>>, vector<1x128x128xf32>
    %25 = vector.shape_cast %24 : vector<1x128x128xf32> to vector<128x128xf32>
    %cst_19 = arith.constant dense<0.000000e+00> : vector<8x128xf32>
    %26 = tpu.matmul %23, %25, %cst_19 {dimension_numbers = #tpu.dot_dimension_numbers<[1], [0], [0], [1], [0, 0, 1, 1], [], []>} : vector<8x128xf32>, vector<128x128xf32>, vector<8x128xf32> -> vector<8x128xf32>
    %c2 = arith.constant 2 : index
    %c0_20 = arith.constant 0 : index
    %c0_21 = arith.constant 0 : index
    %27 = vector.load %arg4[%c2, %c0_20, %c0_21] : memref<9x1x128xf32, #tpu.memory_space<vmem>>, vector<1x1x128xf32>
    %28 = vector.shape_cast %27 : vector<1x1x128xf32> to vector<1x128xf32>
    %29 = vector.broadcast %28 : vector<1x128xf32> to vector<8x128xf32>
    %30 = arith.addf %26, %29 : vector<8x128xf32>
    %cst_22 = arith.constant 0.000000e+00 : f32
    %31 = vector.broadcast %cst_22 : f32 to vector<8x128xf32>
    %32 = arith.cmpf ogt, %30, %31 : vector<8x128xf32>
    %cst_23 = arith.constant 0.00999999977 : f32
    %33 = vector.broadcast %cst_23 : f32 to vector<8x128xf32>
    %34 = arith.mulf %33, %30 : vector<8x128xf32>
    %35 = arith.select %32, %30, %34 : vector<8x128xi1>, vector<8x128xf32>
    %c2_24 = arith.constant 2 : index
    %c0_25 = arith.constant 0 : index
    %c0_26 = arith.constant 0 : index
    %36 = vector.load %arg3[%c2_24, %c0_25, %c0_26] : memref<8x128x128xf32, #tpu.memory_space<vmem>>, vector<1x128x128xf32>
    %37 = vector.shape_cast %36 : vector<1x128x128xf32> to vector<128x128xf32>
    %cst_27 = arith.constant dense<0.000000e+00> : vector<8x128xf32>
    %38 = tpu.matmul %35, %37, %cst_27 {dimension_numbers = #tpu.dot_dimension_numbers<[1], [0], [0], [1], [0, 0, 1, 1], [], []>} : vector<8x128xf32>, vector<128x128xf32>, vector<8x128xf32> -> vector<8x128xf32>
    %c3 = arith.constant 3 : index
    %c0_28 = arith.constant 0 : index
    %c0_29 = arith.constant 0 : index
    %39 = vector.load %arg4[%c3, %c0_28, %c0_29] : memref<9x1x128xf32, #tpu.memory_space<vmem>>, vector<1x1x128xf32>
    %40 = vector.shape_cast %39 : vector<1x1x128xf32> to vector<1x128xf32>
    %41 = vector.broadcast %40 : vector<1x128xf32> to vector<8x128xf32>
    %42 = arith.addf %38, %41 : vector<8x128xf32>
    %cst_30 = arith.constant 0.000000e+00 : f32
    %43 = vector.broadcast %cst_30 : f32 to vector<8x128xf32>
    %44 = arith.cmpf ogt, %42, %43 : vector<8x128xf32>
    %cst_31 = arith.constant 0.00999999977 : f32
    %45 = vector.broadcast %cst_31 : f32 to vector<8x128xf32>
    %46 = arith.mulf %45, %42 : vector<8x128xf32>
    %47 = arith.select %44, %42, %46 : vector<8x128xi1>, vector<8x128xf32>
    %c3_32 = arith.constant 3 : index
    %c0_33 = arith.constant 0 : index
    %c0_34 = arith.constant 0 : index
    %48 = vector.load %arg3[%c3_32, %c0_33, %c0_34] : memref<8x128x128xf32, #tpu.memory_space<vmem>>, vector<1x128x128xf32>
    %49 = vector.shape_cast %48 : vector<1x128x128xf32> to vector<128x128xf32>
    %cst_35 = arith.constant dense<0.000000e+00> : vector<8x128xf32>
    %50 = tpu.matmul %47, %49, %cst_35 {dimension_numbers = #tpu.dot_dimension_numbers<[1], [0], [0], [1], [0, 0, 1, 1], [], []>} : vector<8x128xf32>, vector<128x128xf32>, vector<8x128xf32> -> vector<8x128xf32>
    %c4 = arith.constant 4 : index
    %c0_36 = arith.constant 0 : index
    %c0_37 = arith.constant 0 : index
    %51 = vector.load %arg4[%c4, %c0_36, %c0_37] : memref<9x1x128xf32, #tpu.memory_space<vmem>>, vector<1x1x128xf32>
    %52 = vector.shape_cast %51 : vector<1x1x128xf32> to vector<1x128xf32>
    %53 = vector.broadcast %52 : vector<1x128xf32> to vector<8x128xf32>
    %54 = arith.addf %50, %53 : vector<8x128xf32>
    %cst_38 = arith.constant 0.000000e+00 : f32
    %55 = vector.broadcast %cst_38 : f32 to vector<8x128xf32>
    %56 = arith.cmpf ogt, %54, %55 : vector<8x128xf32>
    %cst_39 = arith.constant 0.00999999977 : f32
    %57 = vector.broadcast %cst_39 : f32 to vector<8x128xf32>
    %58 = arith.mulf %57, %54 : vector<8x128xf32>
    %59 = arith.select %56, %54, %58 : vector<8x128xi1>, vector<8x128xf32>
    %c4_40 = arith.constant 4 : index
    %c0_41 = arith.constant 0 : index
    %c0_42 = arith.constant 0 : index
    %60 = vector.load %arg3[%c4_40, %c0_41, %c0_42] : memref<8x128x128xf32, #tpu.memory_space<vmem>>, vector<1x128x128xf32>
    %61 = vector.shape_cast %60 : vector<1x128x128xf32> to vector<128x128xf32>
    %cst_43 = arith.constant dense<0.000000e+00> : vector<8x128xf32>
    %62 = tpu.matmul %59, %61, %cst_43 {dimension_numbers = #tpu.dot_dimension_numbers<[1], [0], [0], [1], [0, 0, 1, 1], [], []>} : vector<8x128xf32>, vector<128x128xf32>, vector<8x128xf32> -> vector<8x128xf32>
    %c5 = arith.constant 5 : index
    %c0_44 = arith.constant 0 : index
    %c0_45 = arith.constant 0 : index
    %63 = vector.load %arg4[%c5, %c0_44, %c0_45] : memref<9x1x128xf32, #tpu.memory_space<vmem>>, vector<1x1x128xf32>
    %64 = vector.shape_cast %63 : vector<1x1x128xf32> to vector<1x128xf32>
    %65 = vector.broadcast %64 : vector<1x128xf32> to vector<8x128xf32>
    %66 = arith.addf %62, %65 : vector<8x128xf32>
    %cst_46 = arith.constant 0.000000e+00 : f32
    %67 = vector.broadcast %cst_46 : f32 to vector<8x128xf32>
    %68 = arith.cmpf ogt, %66, %67 : vector<8x128xf32>
    %cst_47 = arith.constant 0.00999999977 : f32
    %69 = vector.broadcast %cst_47 : f32 to vector<8x128xf32>
    %70 = arith.mulf %69, %66 : vector<8x128xf32>
    %71 = arith.select %68, %66, %70 : vector<8x128xi1>, vector<8x128xf32>
    %c5_48 = arith.constant 5 : index
    %c0_49 = arith.constant 0 : index
    %c0_50 = arith.constant 0 : index
    %72 = vector.load %arg3[%c5_48, %c0_49, %c0_50] : memref<8x128x128xf32, #tpu.memory_space<vmem>>, vector<1x128x128xf32>
    %73 = vector.shape_cast %72 : vector<1x128x128xf32> to vector<128x128xf32>
    %cst_51 = arith.constant dense<0.000000e+00> : vector<8x128xf32>
    %74 = tpu.matmul %71, %73, %cst_51 {dimension_numbers = #tpu.dot_dimension_numbers<[1], [0], [0], [1], [0, 0, 1, 1], [], []>} : vector<8x128xf32>, vector<128x128xf32>, vector<8x128xf32> -> vector<8x128xf32>
    %c6 = arith.constant 6 : index
    %c0_52 = arith.constant 0 : index
    %c0_53 = arith.constant 0 : index
    %75 = vector.load %arg4[%c6, %c0_52, %c0_53] : memref<9x1x128xf32, #tpu.memory_space<vmem>>, vector<1x1x128xf32>
    %76 = vector.shape_cast %75 : vector<1x1x128xf32> to vector<1x128xf32>
    %77 = vector.broadcast %76 : vector<1x128xf32> to vector<8x128xf32>
    %78 = arith.addf %74, %77 : vector<8x128xf32>
    %cst_54 = arith.constant 0.000000e+00 : f32
    %79 = vector.broadcast %cst_54 : f32 to vector<8x128xf32>
    %80 = arith.cmpf ogt, %78, %79 : vector<8x128xf32>
    %cst_55 = arith.constant 0.00999999977 : f32
    %81 = vector.broadcast %cst_55 : f32 to vector<8x128xf32>
    %82 = arith.mulf %81, %78 : vector<8x128xf32>
    %83 = arith.select %80, %78, %82 : vector<8x128xi1>, vector<8x128xf32>
    %c6_56 = arith.constant 6 : index
    %c0_57 = arith.constant 0 : index
    %c0_58 = arith.constant 0 : index
    %84 = vector.load %arg3[%c6_56, %c0_57, %c0_58] : memref<8x128x128xf32, #tpu.memory_space<vmem>>, vector<1x128x128xf32>
    %85 = vector.shape_cast %84 : vector<1x128x128xf32> to vector<128x128xf32>
    %cst_59 = arith.constant dense<0.000000e+00> : vector<8x128xf32>
    %86 = tpu.matmul %83, %85, %cst_59 {dimension_numbers = #tpu.dot_dimension_numbers<[1], [0], [0], [1], [0, 0, 1, 1], [], []>} : vector<8x128xf32>, vector<128x128xf32>, vector<8x128xf32> -> vector<8x128xf32>
    %c7 = arith.constant 7 : index
    %c0_60 = arith.constant 0 : index
    %c0_61 = arith.constant 0 : index
    %87 = vector.load %arg4[%c7, %c0_60, %c0_61] : memref<9x1x128xf32, #tpu.memory_space<vmem>>, vector<1x1x128xf32>
    %88 = vector.shape_cast %87 : vector<1x1x128xf32> to vector<1x128xf32>
    %89 = vector.broadcast %88 : vector<1x128xf32> to vector<8x128xf32>
    %90 = arith.addf %86, %89 : vector<8x128xf32>
    %cst_62 = arith.constant 0.000000e+00 : f32
    %91 = vector.broadcast %cst_62 : f32 to vector<8x128xf32>
    %92 = arith.cmpf ogt, %90, %91 : vector<8x128xf32>
    %cst_63 = arith.constant 0.00999999977 : f32
    %93 = vector.broadcast %cst_63 : f32 to vector<8x128xf32>
    %94 = arith.mulf %93, %90 : vector<8x128xf32>
    %95 = arith.select %92, %90, %94 : vector<8x128xi1>, vector<8x128xf32>
    %c7_64 = arith.constant 7 : index
    %c0_65 = arith.constant 0 : index
    %c0_66 = arith.constant 0 : index
    %96 = vector.load %arg3[%c7_64, %c0_65, %c0_66] : memref<8x128x128xf32, #tpu.memory_space<vmem>>, vector<1x128x128xf32>
    %97 = vector.shape_cast %96 : vector<1x128x128xf32> to vector<128x128xf32>
    %cst_67 = arith.constant dense<0.000000e+00> : vector<8x128xf32>
    %98 = tpu.matmul %95, %97, %cst_67 {dimension_numbers = #tpu.dot_dimension_numbers<[1], [0], [0], [1], [0, 0, 1, 1], [], []>} : vector<8x128xf32>, vector<128x128xf32>, vector<8x128xf32> -> vector<8x128xf32>
    %c8 = arith.constant 8 : index
    %c0_68 = arith.constant 0 : index
    %c0_69 = arith.constant 0 : index
    %99 = vector.load %arg4[%c8, %c0_68, %c0_69] : memref<9x1x128xf32, #tpu.memory_space<vmem>>, vector<1x1x128xf32>
    %100 = vector.shape_cast %99 : vector<1x1x128xf32> to vector<1x128xf32>
    %101 = vector.broadcast %100 : vector<1x128xf32> to vector<8x128xf32>
    %102 = arith.addf %98, %101 : vector<8x128xf32>
    %103 = arith.addf %102, %47 : vector<8x128xf32>
    %c0_70 = arith.constant 0 : index
    %c0_71 = arith.constant 0 : index
    %104 = vector.load %arg5[%c0_70, %c0_71] : memref<8x128xf32, #tpu.memory_space<vmem>>, vector<8x128xf32>
    tpu.vector_store %arg5[%c0_70, %c0_71], %103 {strides = array<i32>} : memref<8x128xf32, #tpu.memory_space<vmem>>, vector<8x128xf32>,
    return
  }
  func.func @transform_0(%arg0: i32) -> (i32, i32) {
    %c0_i32 = arith.constant 0 : i32
    %c0_i32_0 = arith.constant 0 : i32
    return %arg0, %c0_i32 : i32, i32
  }
  func.func @transform_1(%arg0: i32) -> (i32, i32) {
    %c0_i32 = arith.constant 0 : i32
    %c0_i32_0 = arith.constant 0 : i32
    %c0_i32_1 = arith.constant 0 : i32
    return %c0_i32, %c0_i32_0 : i32, i32
  }
  func.func @transform_2(%arg0: i32) -> (i32, i32, i32) {
    %c0_i32 = arith.constant 0 : i32
    %c0_i32_0 = arith.constant 0 : i32
    %c0_i32_1 = arith.constant 0 : i32
    %c0_i32_2 = arith.constant 0 : i32
    return %c0_i32, %c0_i32_0, %c0_i32_1 : i32, i32, i32
  }
  func.func @transform_3(%arg0: i32) -> (i32, i32, i32) {
    %c0_i32 = arith.constant 0 : i32
    %c0_i32_0 = arith.constant 0 : i32
    %c0_i32_1 = arith.constant 0 : i32
    %c0_i32_2 = arith.constant 0 : i32
    return %c0_i32, %c0_i32_0, %c0_i32_1 : i32, i32, i32
  }
  func.func @transform_4(%arg0: i32) -> (i32, i32) {
    %c0_i32 = arith.constant 0 : i32
    %c0_i32_0 = arith.constant 0 : i32
    return %arg0, %c0_i32 : i32, i32
  }
}

</mosaic_0001>

<bundles_post_ra>
// kernel: tpu_custom_call.1
= control target key start
LH: loop header
LB: loop body
LE: loop exit
PB: predicated region body
PF: predicated region fallthrough
CT: control target
= control target key end

     0   :  { %9 = vsyncpa [#allocation3], 0  ;;  %s1886_s0 = inlined_call_operand.hbm [shape: f32[8,16], index: 0, kind: input, shape index: {}]   ;;  %s1887_s1 = inlined_call_operand.hbm [shape: f32[16,128], index: 1, kind: input, shape index: {}]   ;;  %s1888_s2 = inlined_call_operand.hbm [shape: f32[8,128,128], index: 2, kind: input, shape index: {}]   ;;  %s1889_s3 = inlined_call_operand.vmem [shape: f32[9,1,128], index: 3, kind: input, shape index: {}]   ;;  %s1890_s4 = inlined_call_operand.hbm [shape: f32[8,128], index: 4, kind: output, shape index: {}]  }
   0x1   :  { %10 = vsyncpa [#allocation6], 0 }
   0x2   :  { %11 = vsyncpa [#allocation4], 0  ;;  %s1684_s15 = smov [#allocation5]   ;;  %s1590_s19 = scalar_lea.hbm %s1887_s1, 256 }
   0x3   :  { %s27_s16 = sshll.u32 %s1684_s15, 4  ;;  %p1591_p0 = scmp.ne.s32.totalorder %s1887_s1, %s1590_s19  ;;  %s28_s16 = int_to_ptr.vmem [resolvable:$true] %s27_s16 }
   0x4   :  { %p1594_p1 = scmp.lt.u32.totalorder %s1590_s19, %s1887_s1 }
   0x6   :  { %p1596_p2 = pnand %p1594_p1, %p1591_p0 }
   0x8   :  { %1599 = shalt.err (!%p1596_p2)
}
   0x9   :  { %s1600_s24 = scalar_lea.vmem %s28_s16, 256  ;;  %p1605_p4 = scmp.lt.s32.totalorder %s28_s16, %s28_s16 }
   0xa   :  { %p1601_p3 = scmp.ne.s32.totalorder %s28_s16, %s1600_s24  ;;  %p1606_p5 = scmp.lt.s32.totalorder %s1600_s24, %s1600_s24 }
   0xc   :  { %p1607_p6 = por %p1606_p5, %p1605_p4 }
   0xe   :  { %p1608_p7 = pnand %p1607_p6, %p1601_p3 }
  0x10   :  { %1611 = shalt.err (!%p1608_p7)
}
  0x11   :  { %s1685_s25 = smov 128   ;;  %s1686_s26 = smov 8  }
  0x12   :  { %33 = dma.hbm_to_vmem [thread:$0]  %s1887_s1, 256, %s28_s16, [#allocation6], %s1685_s25, %s1685_s25, %s1686_s26  }
  0x13   :  { %s1687_s29 = smov [#allocation2]   ;;  %s1688_s5 = smov [#allocation7]  }
  0x14   :  { %s18_s30 = sshll.u32 %s1687_s29, 4  ;;  %s39_s6 = sshll.u32 %s1688_s5, 4  ;;  %s19_s30 = int_to_ptr.vmem [resolvable:$true] %s18_s30  ;;  %s40_s6 = int_to_ptr.vmem [resolvable:$true] %s39_s6 }
  0x15   :  { %s1612_s9 = scalar_lea.hbm %s1886_s0, 128 }
  0x16   :  { %p1613_p8 = scmp.ne.s32.totalorder %s1886_s0, %s1612_s9  ;;  %p1616_p9 = scmp.lt.u32.totalorder %s1612_s9, %s1886_s0 }
  0x18   :  { %p1618_p10 = pnand %p1616_p9, %p1613_p8 }
  0x1a   :  { %1621 = shalt.err (!%p1618_p10)
}
  0x1b   :  { %s1622_s1 = scalar_lea.vmem %s19_s30, 128  ;;  %p1627_p12 = scmp.lt.s32.totalorder %s19_s30, %s19_s30 }
  0x1c   :  { %p1623_p11 = scmp.ne.s32.totalorder %s19_s30, %s1622_s1  ;;  %p1628_p13 = scmp.lt.s32.totalorder %s1622_s1, %s1622_s1 }
  0x1e   :  { %p1629_p0 = por %p1628_p13, %p1627_p12 }
  0x20   :  { %p1630_p1 = pnand %p1629_p0, %p1623_p11 }
  0x22   :  { %1633 = shalt.err (!%p1630_p1)
}
  0x23   :  { %21 = dma.hbm_to_vmem [thread:$0]  %s1886_s0, 128, %s19_s30, [#allocation3]  }
  0x24   :  { %s1634_s18 = scalar_lea.hbm %s1888_s2, 16384 }
  0x25   :  { %p1635_p2 = scmp.ne.s32.totalorder %s1888_s2, %s1634_s18  ;;  %p1638_p3 = scmp.lt.u32.totalorder %s1634_s18, %s1888_s2 }
  0x27   :  { %p1640_p4 = pnand %p1638_p3, %p1635_p2 }
  0x29   :  { %1643 = shalt.err (!%p1640_p4)
}
  0x2a   :  { %s1644_s23 = scalar_lea.vmem %s40_s6, 16384  ;;  %p1649_p6 = scmp.lt.s32.totalorder %s40_s6, %s40_s6 }
  0x2b   :  { %p1645_p5 = scmp.ne.s32.totalorder %s40_s6, %s1644_s23  ;;  %p1650_p7 = scmp.lt.s32.totalorder %s1644_s23, %s1644_s23 }
  0x2d   :  { %p1651_p8 = por %p1650_p7, %p1649_p6 }
  0x2f   :  { %p1652_p9 = pnand %p1651_p8, %p1645_p5 }
  0x31   :  { %1655 = shalt.err (!%p1652_p9)
}
  0x32   :  { %45 = dma.hbm_to_vmem [thread:$0]  %s1888_s2, 16384, %s40_s6, [#allocation6], %s1685_s25, %s1685_s25, %s1686_s26  }
  0x33   :  { %1678 = dma.done.wait [#allocation3], 128  }
  0x34   :  { %1679 = vsyncadd [#allocation3], 4294967168 }
  0x35   :  { %1680 = dma.done.wait [#allocation6], 16640  }
  0x36   :  { %1681 = vsyncadd [#allocation6], 4294950656  ;;  %v1689_v0 = vmov 0.0|0.0   ;;  %vm1690_vm0 = vmmov 0   ;;  %v1691_v1 = vmov 0.0   ;;  %v58_v2 = vld [vmem:[#allocation5] sm:$0xff] }
  0x37   :  { %1386 = vmatprep.subr.bf16.mxu0 %v1689_v0  ;;  %1103 = vmatprep.mubr.msk.f32.mxu0 %vm1690_vm0, %v1691_v1  ;;  %v59_v3 = vld [vmem:[#allocation5 + $0x8] sm:$0xff]  ;;  %v144_v5 = vld [vmem:[#allocation7] sm:$0xff]  ;;  %v145_v6 = vld [vmem:[#allocation7 + $0x8] sm:$0xff]  ;;  %vm67_vm1 = vcmask 130048   ;;  %s1692_s15 = smov [#allocation8]  }
  0x38   :  { %1389 = vmatprep.subr.bf16.mxu1 %v1689_v0  ;;  %1138 = vmatprep.mubr.msk.f32.mxu1 %vm1690_vm0, %v1691_v1  ;;  %v1387_v4 = vpack.c.bf16 %v59_v3, %v58_v2  ;;  %v146_v7 = vld [vmem:[#allocation7 + $0x10] sm:$0xff]  ;;  %v1390_v8 = vpack.c.bf16 %v145_v6, %v144_v5  ;;  %v147_v9 = vld [vmem:[#allocation7 + $0x18] sm:$0xff]  ;;  %v57_v10 = vld [vmem:[#allocation2] sm:$0xff]  ;;  %s932_s16 = sshll.u32 %s1692_s15, 4  ;;  %s933_s16 = int_to_ptr.vmem [resolvable:$true] %s932_s16 }
  0x39   :  { %v1393_v11 = vpack.c.bf16 %v147_v9, %v146_v7  ;;  %v148_v12 = vld [vmem:[#allocation7 + $0x20] sm:$0xff]  ;;  %v149_v13 = vld [vmem:[#allocation7 + $0x28] sm:$0xff]  ;;  %v150_v15 = vld [vmem:[#allocation7 + $0x30] sm:$0xff]  ;;  %s1656_s17 = scalar_lea.vmem %s933_s16, 128  ;;  %p1661_p11 = scmp.lt.s32.totalorder %s933_s16, %s933_s16 }
  0x3a   :  { %1388 = vmatpush3.bf16.msra.mxu0 %v1387_v4  ;;  %1391 = vmatpush3.bf16.msra.mxu1 %v1390_v8  ;;  %v1396_v14 = vpack.c.bf16 %v149_v13, %v148_v12  ;;  %v151_v16 = vld [vmem:[#allocation7 + $0x38] sm:$0xff]  ;;  %v152_v18 = vld [vmem:[#allocation7 + $0x40] sm:$0xff]  ;;  %v153_v19 = vld [vmem:[#allocation7 + $0x48] sm:$0xff]  ;;  %p1657_p10 = scmp.ne.s32.totalorder %s933_s16, %s1656_s17  ;;  %p1662_p12 = scmp.lt.s32.totalorder %s1656_s17, %s1656_s17 }
  0x3b   :  { %1413 = vmatprep.subr.bf16.mxu0 %v1689_v0  ;;  %1392 = vmatprep.subr.bf16.mxu1 %v1689_v0  ;;  %v1399_v17 = vpack.c.bf16 %v151_v16, %v150_v15  ;;  %v1402_v20 = vpack.c.bf16 %v153_v19, %v152_v18  ;;  %v154_v21 = vld [vmem:[#allocation7 + $0x50] sm:$0xff]  ;;  %v155_v22 = vld [vmem:[#allocation7 + $0x58] sm:$0xff]  ;;  %v156_v24 = vld [vmem:[#allocation7 + $0x60] sm:$0xff] }
  0x3c   :  { %v1405_v23 = vpack.c.bf16 %v155_v22, %v154_v21  ;;  %v157_v25 = vld [vmem:[#allocation7 + $0x68] sm:$0xff]  ;;  %v158_v27 = vld [vmem:[#allocation7 + $0x70] sm:$0xff]  ;;  %v159_v28 = vld [vmem:[#allocation7 + $0x78] sm:$0xff]  ;;  %p1663_p13 = por %p1662_p12, %p1661_p11 }
  0x3d   :  { %1104 = vmatmul.mubr.msk.f32.vlgmr.msra.gmra.mrb[0].mxu0 %vm67_vm1, %v57_v10  ;;  %v1408_v26 = vpack.c.bf16 %v157_v25, %v156_v24  ;;  %v1411_v29 = vpack.c.bf16 %v159_v28, %v158_v27  ;;  %v242_v30 = vld [vmem:[#allocation7 + $0x80] sm:$0xff]  ;;  %v243_v31 = vld [vmem:[#allocation7 + $0x88] sm:$0xff]  ;;  %v244_v32 = vld [vmem:[#allocation7 + $0x90] sm:$0xff] }
  0x3e   :  { %1173 = vmatprep.mubr.msk.f32.mxu0 %vm1690_vm0, %v1691_v1  ;;  %1394 = vmatpush3.bf16.msra.mxu1 %v1393_v11  ;;  %v1414_v33 = vpack.c.bf16 %v243_v31, %v242_v30  ;;  %v245_v34 = vld [vmem:[#allocation7 + $0x98] sm:$0xff]  ;;  %v246_v36 = vld [vmem:[#allocation7 + $0xa0] sm:$0xff]  ;;  %v247_v37 = vld [vmem:[#allocation7 + $0xa8] sm:$0xff]  ;;  %p1664_p0 = pnand %p1663_p13, %p1657_p10 }
  0x3f   :  { %1395 = vmatprep.subr.bf16.mxu1 %v1689_v0  ;;  %v1417_v35 = vpack.c.bf16 %v245_v34, %v244_v32  ;;  %v1420_v38 = vpack.c.bf16 %v247_v37, %v246_v36  ;;  %v248_v39 = vld [vmem:[#allocation7 + $0xb0] sm:$0xff]  ;;  %v249_v40 = vld [vmem:[#allocation7 + $0xb8] sm:$0xff]  ;;  %v250_v42 = vld [vmem:[#allocation7 + $0xc0] sm:$0xff] }
  0x40   :  { %1415 = vmatpush3.bf16.msra.mxu0 %v1414_v33  ;;  %v1423_v41 = vpack.c.bf16 %v249_v40, %v248_v39  ;;  %v251_v43 = vld [vmem:[#allocation7 + $0xc8] sm:$0xff]  ;;  %v252_v45 = vld [vmem:[#allocation7 + $0xd0] sm:$0xff]  ;;  %v253_v46 = vld [vmem:[#allocation7 + $0xd8] sm:$0xff] }
  0x41   :  { %1416 = vmatprep.subr.bf16.mxu0 %v1689_v0  ;;  %v1426_v44 = vpack.c.bf16 %v251_v43, %v250_v42  ;;  %v1429_v47 = vpack.c.bf16 %v253_v46, %v252_v45  ;;  %v254_v48 = vld [vmem:[#allocation7 + $0xe0] sm:$0xff]  ;;  %v255_v49 = vld [vmem:[#allocation7 + $0xe8] sm:$0xff]  ;;  %v942_v51 = vld [vmem:[%s1889_s3] ss:$0 sm:$0xff] }
  0x42   :  { %1397 = vmatpush3.bf16.msra.mxu1 %v1396_v14  ;;  %v1432_v50 = vpack.c.bf16 %v255_v49, %v254_v48  ;;  %v256_v57 = vld [vmem:[#allocation7 + $0xf0] sm:$0xff]  ;;  %v257_v58 = vld [vmem:[#allocation7 + $0xf8] sm:$0xff]  ;;  %v340_v60 = vld [vmem:[#allocation7 + $0x100] sm:$0xff] }
  0x43   :  { %1398 = vmatprep.subr.bf16.mxu1 %v1689_v0  ;;  %v1435_v59 = vpack.c.bf16 %v257_v58, %v256_v57  ;;  %v341_v61 = vld [vmem:[#allocation7 + $0x108] sm:$0xff]  ;;  %v342_v62 = vld [vmem:[#allocation7 + $0x110] sm:$0xff]  ;;  %v343_v2 = vld [vmem:[#allocation7 + $0x118] sm:$0xff] }
  0x44   :  { %1418 = vmatpush3.bf16.msra.mxu0 %v1417_v35  ;;  %v1438_v63 = vpack.c.bf16 %v341_v61, %v340_v60  ;;  %v1441_v3 = vpack.c.bf16 %v343_v2, %v342_v62  ;;  %v344_v4 = vld [vmem:[#allocation7 + $0x120] sm:$0xff]  ;;  %v345_v5 = vld [vmem:[#allocation7 + $0x128] sm:$0xff]  ;;  %v346_v7 = vld [vmem:[#allocation7 + $0x130] sm:$0xff] }
  0x45   :  { %1419 = vmatprep.subr.bf16.mxu0 %v1689_v0  ;;  %v1444_v6 = vpack.c.bf16 %v345_v5, %v344_v4  ;;  %v347_v8 = vld [vmem:[#allocation7 + $0x138] sm:$0xff]  ;;  %v348_v10 = vld [vmem:[#allocation7 + $0x140] sm:$0xff]  ;;  %v349_v11 = vld [vmem:[#allocation7 + $0x148] sm:$0xff] }
  0x46   :  { %1400 = vmatpush3.bf16.msra.mxu1 %v1399_v17  ;;  %v1447_v9 = vpack.c.bf16 %v347_v8, %v346_v7  ;;  %v1450_v12 = vpack.c.bf16 %v349_v11, %v348_v10  ;;  %v350_v13 = vld [vmem:[#allocation7 + $0x150] sm:$0xff]  ;;  %v351_v14 = vld [vmem:[#allocation7 + $0x158] sm:$0xff]  ;;  %v352_v16 = vld [vmem:[#allocation7 + $0x160] sm:$0xff] }
  0x47   :  { %1401 = vmatprep.subr.bf16.mxu1 %v1689_v0  ;;  %v1453_v15 = vpack.c.bf16 %v351_v14, %v350_v13  ;;  %v353_v17 = vld [vmem:[#allocation7 + $0x168] sm:$0xff]  ;;  %v945_v19 = vld [vmem:[%s1889_s3 + $0x1] ss:$0 sm:$0xff]  ;;  %v354_v25 = vld [vmem:[#allocation7 + $0x170] sm:$0xff] }
  0x48   :  { %1421 = vmatpush3.bf16.msra.mxu0 %v1420_v38  ;;  %v1456_v18 = vpack.c.bf16 %v353_v17, %v352_v16  ;;  %v438_v28 = vld [vmem:[#allocation7 + $0x180] sm:$0xff]  ;;  %v440_v30 = vld [vmem:[#allocation7 + $0x190] sm:$0xff]  ;;  %v441_v32 = vld [vmem:[#allocation7 + $0x198] sm:$0xff] }
  0x49   :  { %1422 = vmatprep.subr.bf16.mxu0 %v1689_v0  ;;  %v1465_v33 = vpack.c.bf16 %v441_v32, %v440_v30  ;;  %v442_v34 = vld [vmem:[#allocation7 + $0x1a0] sm:$0xff]  ;;  %v443_v35 = vld [vmem:[#allocation7 + $0x1a8] sm:$0xff]  ;;  %v444_v37 = vld [vmem:[#allocation7 + $0x1b0] sm:$0xff] }
  0x4a   :  { %1403 = vmatpush3.bf16.msra.mxu1 %v1402_v20  ;;  %v1468_v36 = vpack.c.bf16 %v443_v35, %v442_v34  ;;  %v445_v38 = vld [vmem:[#allocation7 + $0x1b8] sm:$0xff]  ;;  %v446_v40 = vld [vmem:[#allocation7 + $0x1c0] sm:$0xff]  ;;  %v448_v43 = vld [vmem:[#allocation7 + $0x1d0] sm:$0xff] }
  0x4b   :  { %1404 = vmatprep.subr.bf16.mxu1 %v1689_v0  ;;  %v1471_v39 = vpack.c.bf16 %v445_v38, %v444_v37  ;;  %v450_v46 = vld [vmem:[#allocation7 + $0x1e0] sm:$0xff]  ;;  %v947_v49 = vld [vmem:[%s1889_s3 + $0x2] ss:$0 sm:$0xff]  ;;  %v538_v60 = vld [vmem:[#allocation7 + $0x210] sm:$0xff] }
  0x4c   :  { %1424 = vmatpush3.bf16.msra.mxu0 %v1423_v41  ;;  %v447_v41 = vld [vmem:[#allocation7 + $0x1c8] sm:$0xff]  ;;  %v536_v58 = vld [vmem:[#allocation7 + $0x200] sm:$0xff]  ;;  %v539_v62 = vld [vmem:[#allocation7 + $0x218] sm:$0xff] }
  0x4d   :  { %1425 = vmatprep.subr.bf16.mxu0 %v1689_v0  ;;  %v1474_v42 = vpack.c.bf16 %v447_v41, %v446_v40  ;;  %v540_v2 = vld [vmem:[#allocation7 + $0x220] sm:$0xff]  ;;  %v542_v5 = vld [vmem:[#allocation7 + $0x230] sm:$0xff]  ;;  %v949_v17 = vld [vmem:[%s1889_s3 + $0x3] ss:$0 sm:$0xff] }
  0x4e   :  { %1406 = vmatpush3.bf16.msra.mxu1 %v1405_v23  ;;  %v544_v8 = vld [vmem:[#allocation7 + $0x240] sm:$0xff]  ;;  %v546_v11 = vld [vmem:[#allocation7 + $0x250] sm:$0xff]  ;;  %v637_v30 = vld [vmem:[#allocation7 + $0x298] sm:$0xff] }
  0x4f   :  { %1407 = vmatprep.subr.bf16.mxu1 %v1689_v0  ;;  %v548_v14 = vld [vmem:[#allocation7 + $0x260] sm:$0xff]  ;;  %v640_v35 = vld [vmem:[#allocation7 + $0x2b0] sm:$0xff] }
  0x50   :  { %1427 = vmatpush3.bf16.msra.mxu0 %v1426_v44  ;;  %v449_v44 = vld [vmem:[#allocation7 + $0x1d8] sm:$0xff]  ;;  %v638_v32 = vld [vmem:[#allocation7 + $0x2a0] sm:$0xff]  ;;  %v644_v41 = vld [vmem:[#allocation7 + $0x2d0] sm:$0xff] }
  0x51   :  { %1428 = vmatprep.subr.bf16.mxu0 %v1689_v0  ;;  %v1477_v45 = vpack.c.bf16 %v449_v44, %v448_v43  ;;  %v642_v38 = vld [vmem:[#allocation7 + $0x2c0] sm:$0xff] }
  0x52   :  { %1409 = vmatpush3.bf16.msra.mxu1 %v1408_v26  ;;  %v355_v26 = vld [vmem:[#allocation7 + $0x178] sm:$0xff]  ;;  %v646_v44 = vld [vmem:[#allocation7 + $0x2e0] sm:$0xff] }
  0x53   :  { %1410 = vmatprep.subr.bf16.mxu1 %v1689_v0  ;;  %v1459_v27 = vpack.c.bf16 %v355_v26, %v354_v25  ;;  %v634_v26 = vld [vmem:[#allocation7 + $0x280] sm:$0xff] }
  0x54   :  { %1430 = vmatpush3.bf16.msra.mxu0 %v1429_v47  ;;  %v451_v47 = vld [vmem:[#allocation7 + $0x1e8] sm:$0xff] }
  0x55   :  { %1431 = vmatprep.subr.bf16.mxu0 %v1689_v0  ;;  %v1480_v48 = vpack.c.bf16 %v451_v47, %v450_v46  ;;  %v951_v47 = vld [vmem:[%s1889_s3 + $0x4] ss:$0 sm:$0xff] }
  0x56   :  { %1412 = vmatpush3.bf16.msra.mxu1 %v1411_v29  ;;  %v439_v29 = vld [vmem:[#allocation7 + $0x188] sm:$0xff] }
  0x57   :  { %1437 = vmatprep.subr.bf16.mxu1 %v1689_v0  ;;  %v1462_v31 = vpack.c.bf16 %v439_v29, %v438_v28  ;;  %v636_v28 = vld [vmem:[#allocation7 + $0x290] sm:$0xff] }
  0x58   :  { %1433 = vmatpush3.bf16.msra.mxu0 %v1432_v50 }
  0x59   :  { %1434 = vmatprep.subr.bf16.mxu0 %v1689_v0 }
  0x5c   :  { %1436 = vmatpush3.bf16.msra.mxu0 %v1435_v59  ;;  %v537_v59 = vld [vmem:[#allocation7 + $0x208] sm:$0xff] }
  0x5d   :  { %1461 = vmatprep.subr.bf16.mxu0 %v1689_v0  ;;  %v1486_v61 = vpack.c.bf16 %v537_v59, %v536_v58  ;;  %v734_v58 = vld [vmem:[#allocation7 + $0x310] sm:$0xff] }
 0x110   :  { %v137_v52 = vpop.f32.mrb[0].mxu0 }
 0x111   :  { %v138_v53 = vadd.f32 %v942_v51, %v137_v52  ;;  %v1105_v54 = vpop.f32.mrb[1].mxu0 }
 0x113   :  { %v142_v55 = vmul.f32 0.01, %v138_v53  ;;  %vm141_vm2 = vcmp.gt.f32.partialorder %v138_v53, 0.0 }
 0x115   :  { %v143_v56 = vsel %vm141_vm2, %v138_v53, %v142_v55  ;;  %v452_v55 = vld [vmem:[#allocation7 + $0x1f0] sm:$0xff] }
 0x116   :  { %1139 = vmatmul.mubr.f32.vlgmr.msra.gmra.mrb[0].mxu1 %v143_v56  ;;  %v453_v56 = vld [vmem:[#allocation7 + $0x1f8] sm:$0xff] }
 0x117   :  { %1208 = vmatprep.mubr.msk.f32.mxu1 %vm1690_vm0, %v1691_v1  ;;  %1439 = vmatpush3.bf16.msra.mxu1 %v1438_v63  ;;  %v1483_v57 = vpack.c.bf16 %v453_v56, %v452_v55  ;;  %v1489_v63 = vpack.c.bf16 %v539_v62, %v538_v60  ;;  %v732_v56 = vld [vmem:[#allocation7 + $0x300] sm:$0xff]  ;;  %v735_v60 = vld [vmem:[#allocation7 + $0x318] sm:$0xff] }
 0x118   :  { %1440 = vmatprep.subr.bf16.mxu1 %v1689_v0  ;;  %v736_v62 = vld [vmem:[#allocation7 + $0x320] sm:$0xff] }
 0x11b   :  { %1442 = vmatpush3.bf16.msra.mxu1 %v1441_v3  ;;  %v541_v3 = vld [vmem:[#allocation7 + $0x228] sm:$0xff] }
 0x11c   :  { %1443 = vmatprep.subr.bf16.mxu1 %v1689_v0  ;;  %v1492_v4 = vpack.c.bf16 %v541_v3, %v540_v2  ;;  %v738_v3 = vld [vmem:[#allocation7 + $0x330] sm:$0xff] }
 0x11f   :  { %1445 = vmatpush3.bf16.msra.mxu1 %v1444_v6  ;;  %v543_v6 = vld [vmem:[#allocation7 + $0x238] sm:$0xff] }
 0x120   :  { %1446 = vmatprep.subr.bf16.mxu1 %v1689_v0  ;;  %v1495_v7 = vpack.c.bf16 %v543_v6, %v542_v5  ;;  %v740_v6 = vld [vmem:[#allocation7 + $0x340] sm:$0xff] }
 0x123   :  { %1448 = vmatpush3.bf16.msra.mxu1 %v1447_v9  ;;  %v545_v9 = vld [vmem:[#allocation7 + $0x248] sm:$0xff] }
 0x124   :  { %1449 = vmatprep.subr.bf16.mxu1 %v1689_v0  ;;  %v1498_v10 = vpack.c.bf16 %v545_v9, %v544_v8  ;;  %v742_v9 = vld [vmem:[#allocation7 + $0x350] sm:$0xff] }
 0x127   :  { %1451 = vmatpush3.bf16.msra.mxu1 %v1450_v12  ;;  %v547_v12 = vld [vmem:[#allocation7 + $0x258] sm:$0xff] }
 0x128   :  { %1452 = vmatprep.subr.bf16.mxu1 %v1689_v0  ;;  %v1501_v13 = vpack.c.bf16 %v547_v12, %v546_v11  ;;  %v744_v12 = vld [vmem:[#allocation7 + $0x360] sm:$0xff] }
 0x12b   :  { %1454 = vmatpush3.bf16.msra.mxu1 %v1453_v15  ;;  %v549_v15 = vld [vmem:[#allocation7 + $0x268] sm:$0xff] }
 0x12c   :  { %1455 = vmatprep.subr.bf16.mxu1 %v1689_v0  ;;  %v1504_v16 = vpack.c.bf16 %v549_v15, %v548_v14  ;;  %v953_v15 = vld [vmem:[%s1889_s3 + $0x5] ss:$0 sm:$0xff] }
 0x12f   :  { %1457 = vmatpush3.bf16.msra.mxu1 %v1456_v18 }
 0x130   :  { %1458 = vmatprep.subr.bf16.mxu1 %v1689_v0 }
 0x133   :  { %1460 = vmatpush3.bf16.msra.mxu1 %v1459_v27  ;;  %v635_v27 = vld [vmem:[#allocation7 + $0x288] sm:$0xff] }
 0x134   :  { %1485 = vmatprep.subr.bf16.mxu1 %v1689_v0  ;;  %v1510_v29 = vpack.c.bf16 %v635_v27, %v634_v26  ;;  %v831_v26 = vld [vmem:[#allocation7 + $0x388] sm:$0xff]  ;;  %v832_v27 = vld [vmem:[#allocation7 + $0x390] sm:$0xff] }
 0x1e9   :  { %v234_v20 = vpop.f32.mrb[0].mxu1 }
 0x1ea   :  { %v235_v21 = vadd.f32 %v945_v19, %v234_v20  ;;  %v1140_v22 = vpop.f32.mrb[1].mxu1 }
 0x1ec   :  { %vm238_vm3 = vcmp.gt.f32.partialorder %v235_v21, 0.0  ;;  %v239_v23 = vmul.f32 0.01, %v235_v21 }
 0x1ee   :  { %v240_v24 = vsel %vm238_vm3, %v235_v21, %v239_v23  ;;  %v550_v23 = vld [vmem:[#allocation7 + $0x270] sm:$0xff] }
 0x1ef   :  { %1174 = vmatmul.mubr.f32.vlgmr.msra.gmra.mrb[2].mxu0 %v240_v24  ;;  %v551_v24 = vld [vmem:[#allocation7 + $0x278] sm:$0xff] }
 0x1f0   :  { %1243 = vmatprep.mubr.msk.f32.mxu0 %vm1690_vm0, %v1691_v1  ;;  %1463 = vmatpush3.bf16.msra.mxu0 %v1462_v31  ;;  %v1507_v25 = vpack.c.bf16 %v551_v24, %v550_v23  ;;  %v1513_v31 = vpack.c.bf16 %v637_v30, %v636_v28  ;;  %v747_v23 = vld [vmem:[#allocation7 + $0x378] sm:$0xff] }
 0x1f1   :  { %1464 = vmatprep.subr.bf16.mxu0 %v1689_v0 }
 0x1f4   :  { %1466 = vmatpush3.bf16.msra.mxu0 %v1465_v33  ;;  %v639_v33 = vld [vmem:[#allocation7 + $0x2a8] sm:$0xff] }
 0x1f5   :  { %1467 = vmatprep.subr.bf16.mxu0 %v1689_v0  ;;  %v1516_v34 = vpack.c.bf16 %v639_v33, %v638_v32  ;;  %v835_v32 = vld [vmem:[#allocation7 + $0x3a8] sm:$0xff] }
 0x1f8   :  { %1469 = vmatpush3.bf16.msra.mxu0 %v1468_v36  ;;  %v641_v36 = vld [vmem:[#allocation7 + $0x2b8] sm:$0xff] }
 0x1f9   :  { %1470 = vmatprep.subr.bf16.mxu0 %v1689_v0  ;;  %v1519_v37 = vpack.c.bf16 %v641_v36, %v640_v35  ;;  %v838_v36 = vld [vmem:[#allocation7 + $0x3c0] sm:$0xff] }
 0x1fc   :  { %1472 = vmatpush3.bf16.msra.mxu0 %v1471_v39  ;;  %v643_v39 = vld [vmem:[#allocation7 + $0x2c8] sm:$0xff] }
 0x1fd   :  { %1473 = vmatprep.subr.bf16.mxu0 %v1689_v0  ;;  %v1522_v40 = vpack.c.bf16 %v643_v39, %v642_v38  ;;  %v840_v39 = vld [vmem:[#allocation7 + $0x3d0] sm:$0xff] }
 0x200   :  { %1475 = vmatpush3.bf16.msra.mxu0 %v1474_v42  ;;  %v645_v42 = vld [vmem:[#allocation7 + $0x2d8] sm:$0xff] }
 0x201   :  { %1476 = vmatprep.subr.bf16.mxu0 %v1689_v0  ;;  %v1525_v43 = vpack.c.bf16 %v645_v42, %v644_v41  ;;  %v842_v42 = vld [vmem:[#allocation7 + $0x3e0] sm:$0xff] }
 0x204   :  { %1478 = vmatpush3.bf16.msra.mxu0 %v1477_v45  ;;  %v647_v45 = vld [vmem:[#allocation7 + $0x2e8] sm:$0xff] }
 0x205   :  { %1479 = vmatprep.subr.bf16.mxu0 %v1689_v0  ;;  %v1528_v46 = vpack.c.bf16 %v647_v45, %v646_v44  ;;  %v955_v45 = vld [vmem:[%s1889_s3 + $0x6] ss:$0 sm:$0xff] }
 0x208   :  { %1481 = vmatpush3.bf16.msra.mxu0 %v1480_v48 }
 0x209   :  { %1482 = vmatprep.subr.bf16.mxu0 %v1689_v0 }
 0x20c   :  { %1484 = vmatpush3.bf16.msra.mxu0 %v1483_v57  ;;  %v733_v57 = vld [vmem:[#allocation7 + $0x308] sm:$0xff] }
 0x20d   :  { %1509 = vmatprep.subr.bf16.mxu0 %v1689_v0  ;;  %v1534_v59 = vpack.c.bf16 %v733_v57, %v732_v56 }
 0x2c2   :  { %v332_v50 = vpop.f32.mrb[2].mxu0 }
 0x2c3   :  { %v333_v51 = vadd.f32 %v947_v49, %v332_v50  ;;  %v1175_v52 = vpop.f32.mrb[3].mxu0 }
 0x2c5   :  { %vm336_vm4 = vcmp.gt.f32.partialorder %v333_v51, 0.0  ;;  %v337_v53 = vmul.f32 0.01, %v333_v51 }
 0x2c7   :  { %v338_v54 = vsel %vm336_vm4, %v333_v51, %v337_v53  ;;  %v648_v53 = vld [vmem:[#allocation7 + $0x2f0] sm:$0xff] }
 0x2c8   :  { %1209 = vmatmul.mubr.f32.vlgmr.msra.gmra.mrb[2].mxu1 %v338_v54  ;;  %v649_v54 = vld [vmem:[#allocation7 + $0x2f8] sm:$0xff] }
 0x2c9   :  { %1278 = vmatprep.mubr.msk.f32.mxu1 %vm1690_vm0, %v1691_v1  ;;  %1487 = vmatpush3.bf16.msra.mxu1 %v1486_v61  ;;  %v1531_v55 = vpack.c.bf16 %v649_v54, %v648_v53  ;;  %v1537_v61 = vpack.c.bf16 %v735_v60, %v734_v58  ;;  %v957_v54 = vld [vmem:[%s1889_s3 + $0x7] ss:$0 sm:$0xff] }
 0x2ca   :  { %1488 = vmatprep.subr.bf16.mxu1 %v1689_v0 }
 0x2cd   :  { %1490 = vmatpush3.bf16.msra.mxu1 %v1489_v63  ;;  %v737_v63 = vld [vmem:[#allocation7 + $0x328] sm:$0xff] }
 0x2ce   :  { %1491 = vmatprep.subr.bf16.mxu1 %v1689_v0  ;;  %v1540_v2 = vpack.c.bf16 %v737_v63, %v736_v62 }
 0x2d1   :  { %1493 = vmatpush3.bf16.msra.mxu1 %v1492_v4  ;;  %v739_v4 = vld [vmem:[#allocation7 + $0x338] sm:$0xff] }
 0x2d2   :  { %1494 = vmatprep.subr.bf16.mxu1 %v1689_v0  ;;  %v1543_v5 = vpack.c.bf16 %v739_v4, %v738_v3 }
 0x2d5   :  { %1496 = vmatpush3.bf16.msra.mxu1 %v1495_v7  ;;  %v741_v7 = vld [vmem:[#allocation7 + $0x348] sm:$0xff] }
 0x2d6   :  { %1497 = vmatprep.subr.bf16.mxu1 %v1689_v0  ;;  %v1546_v8 = vpack.c.bf16 %v741_v7, %v740_v6 }
 0x2d9   :  { %1499 = vmatpush3.bf16.msra.mxu1 %v1498_v10  ;;  %v743_v10 = vld [vmem:[#allocation7 + $0x358] sm:$0xff] }
 0x2da   :  { %1500 = vmatprep.subr.bf16.mxu1 %v1689_v0  ;;  %v1549_v11 = vpack.c.bf16 %v743_v10, %v742_v9 }
 0x2dd   :  { %1502 = vmatpush3.bf16.msra.mxu1 %v1501_v13  ;;  %v745_v13 = vld [vmem:[#allocation7 + $0x368] sm:$0xff] }
 0x2de   :  { %1503 = vmatprep.subr.bf16.mxu1 %v1689_v0  ;;  %v1552_v14 = vpack.c.bf16 %v745_v13, %v744_v12 }
 0x2e1   :  { %1505 = vmatpush3.bf16.msra.mxu1 %v1504_v16 }
 0x2e2   :  { %1506 = vmatprep.subr.bf16.mxu1 %v1689_v0 }
 0x2e5   :  { %1508 = vmatpush3.bf16.msra.mxu1 %v1507_v25  ;;  %v830_v25 = vld [vmem:[#allocation7 + $0x380] sm:$0xff] }
 0x2e6   :  { %1533 = vmatprep.subr.bf16.mxu1 %v1689_v0  ;;  %v1558_v28 = vpack.c.bf16 %v831_v26, %v830_v25 }
 0x39b   :  { %v430_v18 = vpop.f32.mrb[2].mxu1 }
 0x39c   :  { %v431_v19 = vadd.f32 %v949_v17, %v430_v18  ;;  %v1210_v20 = vpop.f32.mrb[3].mxu1 }
 0x39e   :  { %vm434_vm5 = vcmp.gt.f32.partialorder %v431_v19, 0.0  ;;  %v435_v21 = vmul.f32 0.01, %v431_v19 }
 0x3a0   :  { %v1826_v22 = vsel %vm434_vm5, %v431_v19, %v435_v21  ;;  %v746_v21 = vld [vmem:[#allocation7 + $0x370] sm:$0xff] }
 0x3a1   :  { %1244 = vmatmul.mubr.f32.vlgmr.msra.gmra.mrb[4].mxu0 %v1826_v22  ;;  %v1555_v24 = vpack.c.bf16 %v747_v23, %v746_v21 }
 0x3a2   :  { %1313 = vmatprep.mubr.msk.f32.mxu0 %vm1690_vm0, %v1691_v1  ;;  %1511 = vmatpush3.bf16.msra.mxu0 %v1510_v29  ;;  %v833_v29 = vld [vmem:[#allocation7 + $0x398] sm:$0xff] }
 0x3a3   :  { %1512 = vmatprep.subr.bf16.mxu0 %v1689_v0  ;;  %v1561_v30 = vpack.c.bf16 %v833_v29, %v832_v27 }
 0x3a6   :  { %1514 = vmatpush3.bf16.msra.mxu0 %v1513_v31  ;;  %v834_v31 = vld [vmem:[#allocation7 + $0x3a0] sm:$0xff] }
 0x3a7   :  { %1515 = vmatprep.subr.bf16.mxu0 %v1689_v0  ;;  %v1564_v33 = vpack.c.bf16 %v835_v32, %v834_v31 }
 0x3aa   :  { %1517 = vmatpush3.bf16.msra.mxu0 %v1516_v34  ;;  %v837_v34 = vld [vmem:[#allocation7 + $0x3b8] sm:$0xff] }
 0x3ab   :  { %1518 = vmatprep.subr.bf16.mxu0 %v1689_v0 }
 0x3ae   :  { %1520 = vmatpush3.bf16.msra.mxu0 %v1519_v37  ;;  %v839_v37 = vld [vmem:[#allocation7 + $0x3c8] sm:$0xff] }
 0x3af   :  { %1521 = vmatprep.subr.bf16.mxu0 %v1689_v0  ;;  %v1570_v38 = vpack.c.bf16 %v839_v37, %v838_v36 }
 0x3b2   :  { %1523 = vmatpush3.bf16.msra.mxu0 %v1522_v40  ;;  %v841_v40 = vld [vmem:[#allocation7 + $0x3d8] sm:$0xff] }
 0x3b3   :  { %1524 = vmatprep.subr.bf16.mxu0 %v1689_v0  ;;  %v1573_v41 = vpack.c.bf16 %v841_v40, %v840_v39 }
 0x3b6   :  { %1526 = vmatpush3.bf16.msra.mxu0 %v1525_v43  ;;  %v843_v43 = vld [vmem:[#allocation7 + $0x3e8] sm:$0xff] }
 0x3b7   :  { %1527 = vmatprep.subr.bf16.mxu0 %v1689_v0  ;;  %v1576_v44 = vpack.c.bf16 %v843_v43, %v842_v42 }
 0x3ba   :  { %1529 = vmatpush3.bf16.msra.mxu0 %v1528_v46 }
 0x3bb   :  { %1530 = vmatprep.subr.bf16.mxu0 %v1689_v0 }
 0x3be   :  { %1532 = vmatpush3.bf16.msra.mxu0 %v1531_v55 }
 0x3bf   :  { %1557 = vmatprep.subr.bf16.mxu0 %v1689_v0 }
 0x474   :  { %v528_v48 = vpop.f32.mrb[4].mxu0 }
 0x475   :  { %v529_v49 = vadd.f32 %v951_v47, %v528_v48  ;;  %v1245_v50 = vpop.f32.mrb[5].mxu0 }
 0x477   :  { %vm532_vm6 = vcmp.gt.f32.partialorder %v529_v49, 0.0  ;;  %v533_v51 = vmul.f32 0.01, %v529_v49 }
 0x479   :  { %v534_v52 = vsel %vm532_vm6, %v529_v49, %v533_v51  ;;  %v844_v51 = vld [vmem:[#allocation7 + $0x3f0] sm:$0xff] }
 0x47a   :  { %1279 = vmatmul.mubr.f32.vlgmr.msra.gmra.mrb[4].mxu1 %v534_v52  ;;  %v845_v52 = vld [vmem:[#allocation7 + $0x3f8] sm:$0xff] }
 0x47b   :  { %1348 = vmatprep.mubr.msk.f32.mxu1 %vm1690_vm0, %v1691_v1  ;;  %1535 = vmatpush3.bf16.msra.mxu1 %v1534_v59  ;;  %v1579_v53 = vpack.c.bf16 %v845_v52, %v844_v51  ;;  %v959_v59 = vld [vmem:[%s1889_s3 + $0x8] ss:$0 sm:$0xff] }
 0x47c   :  { %1536 = vmatprep.subr.bf16.mxu1 %v1689_v0 }
 0x47f   :  { %1538 = vmatpush3.bf16.msra.mxu1 %v1537_v61 }
 0x480   :  { %1539 = vmatprep.subr.bf16.mxu1 %v1689_v0 }
 0x483   :  { %1541 = vmatpush3.bf16.msra.mxu1 %v1540_v2 }
 0x484   :  { %1542 = vmatprep.subr.bf16.mxu1 %v1689_v0 }
 0x487   :  { %1544 = vmatpush3.bf16.msra.mxu1 %v1543_v5 }
 0x488   :  { %1545 = vmatprep.subr.bf16.mxu1 %v1689_v0 }
 0x48b   :  { %1547 = vmatpush3.bf16.msra.mxu1 %v1546_v8 }
 0x48c   :  { %1548 = vmatprep.subr.bf16.mxu1 %v1689_v0 }
 0x48f   :  { %1550 = vmatpush3.bf16.msra.mxu1 %v1549_v11 }
 0x490   :  { %1551 = vmatprep.subr.bf16.mxu1 %v1689_v0 }
 0x493   :  { %1553 = vmatpush3.bf16.msra.mxu1 %v1552_v14 }
 0x494   :  { %1554 = vmatprep.subr.bf16.mxu1 %v1689_v0 }
 0x497   :  { %1556 = vmatpush3.bf16.msra.mxu1 %v1555_v24 }
 0x54d   :  { %v626_v16 = vpop.f32.mrb[4].mxu1 }
 0x54e   :  { %v627_v17 = vadd.f32 %v953_v15, %v626_v16  ;;  %v1280_v18 = vpop.f32.mrb[5].mxu1 }
 0x550   :  { %vm630_vm7 = vcmp.gt.f32.partialorder %v627_v17, 0.0  ;;  %v631_v19 = vmul.f32 0.01, %v627_v17 }
 0x552   :  { %v632_v20 = vsel %vm630_vm7, %v627_v17, %v631_v19 }
 0x553   :  { %1314 = vmatmul.mubr.f32.vlgmr.msra.gmra.mrb[6].mxu0 %v632_v20 }
 0x554   :  { %1383 = vmatprep.mubr.msk.f32.mxu0 %vm1690_vm0, %v1691_v1  ;;  %1559 = vmatpush3.bf16.msra.mxu0 %v1558_v28  ;;  %v836_v1 = vld [vmem:[#allocation7 + $0x3b0] sm:$0xff] }
 0x555   :  { %1560 = vmatprep.subr.bf16.mxu0 %v1689_v0  ;;  %v1567_v35 = vpack.c.bf16 %v837_v34, %v836_v1 }
 0x558   :  { %1562 = vmatpush3.bf16.msra.mxu0 %v1561_v30 }
 0x559   :  { %1563 = vmatprep.subr.bf16.mxu0 %v1689_v0 }
 0x55c   :  { %1565 = vmatpush3.bf16.msra.mxu0 %v1564_v33 }
 0x55d   :  { %1566 = vmatprep.subr.bf16.mxu0 %v1689_v0 }
 0x560   :  { %1568 = vmatpush3.bf16.msra.mxu0 %v1567_v35 }
 0x561   :  { %1569 = vmatprep.subr.bf16.mxu0 %v1689_v0 }
 0x564   :  { %1571 = vmatpush3.bf16.msra.mxu0 %v1570_v38 }
 0x565   :  { %1572 = vmatprep.subr.bf16.mxu0 %v1689_v0 }
 0x568   :  { %1574 = vmatpush3.bf16.msra.mxu0 %v1573_v41 }
 0x569   :  { %1575 = vmatprep.subr.bf16.mxu0 %v1689_v0 }
 0x56c   :  { %1577 = vmatpush3.bf16.msra.mxu0 %v1576_v44 }
 0x56d   :  { %1578 = vmatprep.subr.bf16.mxu0 %v1689_v0 }
 0x570   :  { %1580 = vmatpush3.bf16.msra.mxu0 %v1579_v53 }
 0x626   :  { %v724_v46 = vpop.f32.mrb[6].mxu0 }
 0x627   :  { %v725_v47 = vadd.f32 %v955_v45, %v724_v46  ;;  %v1315_v48 = vpop.f32.mrb[7].mxu0 }
 0x629   :  { %vm728_vm8 = vcmp.gt.f32.partialorder %v725_v47, 0.0  ;;  %v729_v49 = vmul.f32 0.01, %v725_v47 }
 0x62b   :  { %v730_v50 = vsel %vm728_vm8, %v725_v47, %v729_v49 }
 0x62c   :  { %1349 = vmatmul.mubr.f32.vlgmr.msra.gmra.mrb[6].mxu1 %v730_v50 }
 0x6ff   :  { %v822_v0 = vpop.f32.mrb[6].mxu1 }
 0x700   :  { %v823_v55 = vadd.f32 %v957_v54, %v822_v0  ;;  %v1350_v56 = vpop.f32.mrb[7].mxu1 }
 0x702   :  { %vm826_vm9 = vcmp.gt.f32.partialorder %v823_v55, 0.0  ;;  %v827_v57 = vmul.f32 0.01, %v823_v55 }
 0x704   :  { %v828_v58 = vsel %vm826_vm9, %v823_v55, %v827_v57 }
 0x705   :  { %1384 = vmatmul.mubr.f32.vlgmr.msra.gmra.mrb[8].mxu0 %v828_v58 }
 0x7d8   :  { %v920_v60 = vpop.f32.mrb[8].mxu0 }
 0x7d9   :  { %v921_v61 = vadd.f32 %v959_v59, %v920_v60  ;;  %v1385_v62 = vpop.f32.mrb[9].mxu0 }
 0x7db   :  { %v924_v63 = vadd.f32 %v921_v61, %v1826_v22 }
 0x7dd   :  { %925 = vst [vmem:[#allocation8] sm:$0xff] %v924_v63 }
 0x7de   :  { %1667 = shalt.err (!%p1664_p0)
}
 0x7df   :  { %s1668_s3 = scalar_lea.hbm %s1890_s4, 128 }
 0x7e0   :  { %p1669_p1 = scmp.ne.s32.totalorder %s1890_s4, %s1668_s3  ;;  %p1672_p2 = scmp.lt.u32.totalorder %s1668_s3, %s1890_s4 }
 0x7e2   :  { %p1674_p3 = pnand %p1672_p2, %p1669_p1 }
 0x7e4   :  { %1677 = shalt.err (!%p1674_p3)
}
 0x7e5   :  { %935 = dma.vmem_to_hbm [thread:$0]  %s933_s16, 128, %s1890_s4, [#allocation4]  }
 0x7e6   :  { %1682 = dma.done.wait [#allocation4], 128  }
 0x7e7   :  { %1683 = vsyncadd [#allocation4], 4294967168 }
 0x7e8   :  { %939 = vsyncpa [#allocation3], 1 }
 0x7e9   :  { %940 = vsyncpa [#allocation6], 1 }
 0x7ea   :  { %941 = vsyncpa [#allocation4], 1 }

</bundles_post_ra>
